<compile_context>
chip_gen: v7x
topology: tpu7x:2x2x1
jax: 0.10.0
libtpu: 0.0.40
codegen_flags: <defaults>
</compile_context>

<pallas_src>
import functools

import jax
import jax.numpy as jnp
from jax.experimental import pallas as pl
from jax.experimental.pallas import tpu as pltpu


# ---------------- Pallas kernel ----------------
def _self_attn_kernel(x_ref, wqkv_ref, bqkv_ref, wo_ref, bo_ref,
                      gamma_ref, beta_ref, out_ref, *, n_heads: int, d_head: int):
    H, dh = n_heads, d_head
    L, D = x_ref.shape[1], x_ref.shape[2]

    # One grid step == one batch element.  x block: (1, L, D).
    x = x_ref[0]                                   # (L, D), kept in input dtype

    # Hoist all small parameters once (no per-loop re-broadcasts).
    w_qkv = wqkv_ref[...]                          # (D, 3D)
    b_qkv = bqkv_ref[...]                          # (1, 3D)
    w_o   = wo_ref[...]                            # (D, D)
    b_o   = bo_ref[...]                            # (1, D)
    gamma = gamma_ref[...]                         # (1, D)
    beta  = beta_ref[...]                          # (1, D)

    # Fused QKV projection: one wide MXU matmul, f32 accumulation.
    qkv = jnp.dot(x, w_qkv, preferred_element_type=jnp.float32) + b_qkv  # (L, 3D) f32

    inv_scale = 1.0 / (float(dh) ** 0.5)           # module: Q / sqrt(d_head)

    def split_heads(t):                            # (L, D) -> (H, L, dh)
        return jnp.transpose(t.reshape(L, H, dh), (1, 0, 2))

    qh = split_heads(qkv[:, 0:D] * inv_scale).astype(x.dtype)
    kh = split_heads(qkv[:, D:2 * D]).astype(x.dtype)
    vh = split_heads(qkv[:, 2 * D:3 * D]).astype(x.dtype)

    # Head-batched scaled dot-product attention; softmax math in f32.
    s = jnp.einsum("hqd,hkd->hqk", qh, kh,
                   preferred_element_type=jnp.float32)                   # (H, L, L)
    s = s - jnp.max(s, axis=-1, keepdims=True)                           # stable softmax
    p = jnp.exp(s)
    p = p / jnp.sum(p, axis=-1, keepdims=True)
    ctx = jnp.einsum("hqk,hkd->hqd", p.astype(x.dtype), vh,
                     preferred_element_type=jnp.float32)                  # (H, L, dh)

    # combine_heads: (H, L, dh) -> (L, D)
    ctx = jnp.transpose(ctx, (1, 0, 2)).reshape(L, D)

    # Output projection + residual (f32).
    out = jnp.dot(ctx.astype(x.dtype), w_o,
                  preferred_element_type=jnp.float32) + b_o
    out = out + x.astype(jnp.float32)

    # LayerNorm over features (biased variance, eps=1e-5 like nn.LayerNorm).
    mu = jnp.mean(out, axis=-1, keepdims=True)
    var = jnp.mean(jnp.square(out - mu), axis=-1, keepdims=True)
    out = (out - mu) * jax.lax.rsqrt(var + 1e-5)
    out = out * gamma + beta

    out_ref[0] = out.astype(out_ref.dtype)


# ---------------- Wrapper ----------------
def self_attention_pallas(x, params, n_heads):
    B, L, D = x.shape
    d_head = D // n_heads

    # Fuse Q/K/V weights & biases -> single (D, 3D) / (1, 3D) operands.
    # (In production this fusion would be done once at parameter-load time.)
    w_qkv = jnp.concatenate([params["wq"], params["wk"], params["wv"]], axis=1)
    b_qkv = jnp.concatenate([params["bq"], params["bk"], params["bv"]], axis=1)

    const2d = lambda shape: pl.BlockSpec(shape, lambda b: (0, 0))

    kernel = functools.partial(_self_attn_kernel, n_heads=n_heads, d_head=d_head)

    return pl.pallas_call(
        kernel,
        out_shape=jax.ShapeDtypeStruct((B, L, D), x.dtype),
        grid_spec=pltpu.PrefetchScalarGridSpec(
            num_scalar_prefetch=0,
            grid=(B,),
            in_specs=[
                pl.BlockSpec((1, L, D), lambda b: (b, 0, 0)),   # x
                const2d((D, 3 * D)), const2d((1, 3 * D)),       # fused W_QKV, b_QKV
                const2d((D, D)), const2d((1, D)),               # W_fc, b_fc
                const2d((1, D)), const2d((1, D)),               # gamma, beta
            ],
            out_specs=pl.BlockSpec((1, L, D), lambda b: (b, 0, 0)),
        ),
        compiler_params=pltpu.CompilerParams(
            dimension_semantics=("parallel",),
            vmem_limit_bytes=32 * 1024 * 1024,
        ),
    )(x, w_qkv, b_qkv, params["wo"], params["bo"], params["gamma"], params["beta"])


# ---------------- Pure-JAX reference (mirrors the PyTorch forward) ----------------
def self_attention_ref(x, params, n_heads):
    B, L, D = x.shape
    d_head = D // n_heads
    q = x @ params["wq"] + params["bq"]
    k = x @ params["wk"] + params["bk"]
    v = x @ params["wv"] + params["bv"]

    def split(t):  # (B, L, D) -> (B, H, L, dh)
        return t.reshape(B, L, n_heads, d_head).transpose(0, 2, 1, 3)

    qh, kh, vh = split(q), split(k), split(v)
    score = jnp.einsum("bhqd,bhkd->bhqk", qh / (d_head ** 0.5), kh)
    att = jax.nn.softmax(score, axis=-1)
    ctx = jnp.einsum("bhqk,bhkd->bhqd", att, vh)
    ctx = ctx.transpose(0, 2, 1, 3).reshape(B, L, D)
    out = ctx @ params["wo"] + params["bo"] + x
    mu = out.mean(-1, keepdims=True)
    var = ((out - mu) ** 2).mean(-1, keepdims=True)
    out = (out - mu) / jnp.sqrt(var + 1e-5)
    return out * params["gamma"] + params["beta"]


def init_params(key, dim):
    keys = jax.random.split(key, 8)
    scale = 0.1
    return {
        "wq": jax.random.normal(keys[0], (dim, dim), jnp.float32) * scale,
        "bq": jax.random.normal(keys[1], (1, dim), jnp.float32) * scale,
        "wk": jax.random.normal(keys[2], (dim, dim), jnp.float32) * scale,
        "bk": jax.random.normal(keys[3], (1, dim), jnp.float32) * scale,
        "wv": jax.random.normal(keys[4], (dim, dim), jnp.float32) * scale,
        "bv": jax.random.normal(keys[5], (1, dim), jnp.float32) * scale,
        "wo": jax.random.normal(keys[6], (dim, dim), jnp.float32) * scale,
        "bo": jax.random.normal(keys[7], (1, dim), jnp.float32) * scale,
        "gamma": jnp.ones((1, dim), jnp.float32),
        "beta": jnp.zeros((1, dim), jnp.float32),
    }


if __name__ == "__main__":
    B, L, DIM, N_HEADS = 2, 8, 32, 4   # d_head = 8
    key = jax.random.PRNGKey(0)
    kx, kp = jax.random.split(key)
    x = jax.random.normal(kx, (B, L, DIM), jnp.float32)
    params = init_params(kp, DIM)

    out = self_attention_pallas(x, params, N_HEADS)
    out = jax.block_until_ready(out)

    ref = self_attention_ref(x, params, N_HEADS)
    assert out.shape == (B, L, DIM)
    assert jnp.allclose(out, ref, atol=1e-4, rtol=1e-4), "mismatch vs reference"
    print("KERNEL_OK")
</pallas_src>

<mosaic_0001>
module attributes {stable_mosaic.version = 11 : i64} {
  func.func @_self_attn_kernel(%arg0: i32, %arg1: memref<1x8x32xf32, #tpu.memory_space<vmem>>, %arg2: memref<32x96xf32, #tpu.memory_space<vmem>>, %arg3: memref<1x96xf32, #tpu.memory_space<vmem>>, %arg4: memref<32x32xf32, #tpu.memory_space<vmem>>, %arg5: memref<1x32xf32, #tpu.memory_space<vmem>>, %arg6: memref<1x32xf32, #tpu.memory_space<vmem>>, %arg7: memref<1x32xf32, #tpu.memory_space<vmem>>, %arg8: memref<1x8x32xf32, #tpu.memory_space<vmem>>) attributes {dimension_semantics = [#tpu.dimension_semantics<parallel>], iteration_bounds = array<i64: 2>, scalar_prefetch = 0 : i64, scratch_operands = 0 : i64, tpu.core_type = #tpu.core_type<tc>, window_params = [{transform_indices = @transform_0, window_bounds = array<i64: 1, 8, 32>}, {pipeline_mode = #tpu.pipeline_mode<synchronous>, transform_indices = @transform_1, window_bounds = array<i64: 32, 96>}, {pipeline_mode = #tpu.pipeline_mode<synchronous>, transform_indices = @transform_2, window_bounds = array<i64: 1, 96>}, {pipeline_mode = #tpu.pipeline_mode<synchronous>, transform_indices = @transform_3, window_bounds = array<i64: 32, 32>}, {pipeline_mode = #tpu.pipeline_mode<synchronous>, transform_indices = @transform_4, window_bounds = array<i64: 1, 32>}, {pipeline_mode = #tpu.pipeline_mode<synchronous>, transform_indices = @transform_5, window_bounds = array<i64: 1, 32>}, {pipeline_mode = #tpu.pipeline_mode<synchronous>, transform_indices = @transform_6, window_bounds = array<i64: 1, 32>}, {transform_indices = @transform_7, window_bounds = array<i64: 1, 8, 32>}]} {
    %c0 = arith.constant 0 : index
    %c0_0 = arith.constant 0 : index
    %c0_1 = arith.constant 0 : index
    %0 = vector.load %arg1[%c0, %c0_0, %c0_1] : memref<1x8x32xf32, #tpu.memory_space<vmem>>, vector<1x8x32xf32>
    %1 = vector.shape_cast %0 : vector<1x8x32xf32> to vector<8x32xf32>
    %c0_2 = arith.constant 0 : index
    %c0_3 = arith.constant 0 : index
    %2 = vector.load %arg2[%c0_2, %c0_3] : memref<32x96xf32, #tpu.memory_space<vmem>>, vector<32x96xf32>
    %c0_4 = arith.constant 0 : index
    %c0_5 = arith.constant 0 : index
    %3 = vector.load %arg3[%c0_4, %c0_5] : memref<1x96xf32, #tpu.memory_space<vmem>>, vector<1x96xf32>
    %c0_6 = arith.constant 0 : index
    %c0_7 = arith.constant 0 : index
    %4 = vector.load %arg4[%c0_6, %c0_7] : memref<32x32xf32, #tpu.memory_space<vmem>>, vector<32x32xf32>
    %c0_8 = arith.constant 0 : index
    %c0_9 = arith.constant 0 : index
    %5 = vector.load %arg5[%c0_8, %c0_9] : memref<1x32xf32, #tpu.memory_space<vmem>>, vector<1x32xf32>
    %c0_10 = arith.constant 0 : index
    %c0_11 = arith.constant 0 : index
    %6 = vector.load %arg6[%c0_10, %c0_11] : memref<1x32xf32, #tpu.memory_space<vmem>>, vector<1x32xf32>
    %c0_12 = arith.constant 0 : index
    %c0_13 = arith.constant 0 : index
    %7 = vector.load %arg7[%c0_12, %c0_13] : memref<1x32xf32, #tpu.memory_space<vmem>>, vector<1x32xf32>
    %cst = arith.constant dense<0.000000e+00> : vector<8x96xf32>
    %8 = tpu.matmul %1, %2, %cst {dimension_numbers = #tpu.dot_dimension_numbers<[1], [0], [0], [1], [0, 0, 1, 1], [], []>} : vector<8x32xf32>, vector<32x96xf32>, vector<8x96xf32> -> vector<8x96xf32>
    %9 = vector.broadcast %3 : vector<1x96xf32> to vector<8x96xf32>
    %10 = arith.addf %8, %9 : vector<8x96xf32>
    %11 = vector.extract_strided_slice %10 {offsets = [0, 0], sizes = [8, 32], strides = [1, 1]} : vector<8x96xf32> to vector<8x32xf32>
    %cst_14 = arith.constant 0.353553385 : f32
    %12 = vector.broadcast %cst_14 : f32 to vector<8x32xf32>
    %13 = arith.mulf %11, %12 : vector<8x32xf32>
    %14 = vector.shape_cast %13 : vector<8x32xf32> to vector<8x4x8xf32>
    %15 = tpu.transpose %14, [1, 0, 2] : vector<8x4x8xf32> -> vector<4x8x8xf32>
    %16 = vector.extract_strided_slice %10 {offsets = [0, 32], sizes = [8, 32], strides = [1, 1]} : vector<8x96xf32> to vector<8x32xf32>
    %17 = vector.shape_cast %16 : vector<8x32xf32> to vector<8x4x8xf32>
    %18 = tpu.transpose %17, [1, 0, 2] : vector<8x4x8xf32> -> vector<4x8x8xf32>
    %19 = vector.extract_strided_slice %10 {offsets = [0, 64], sizes = [8, 32], strides = [1, 1]} : vector<8x96xf32> to vector<8x32xf32>
    %20 = vector.shape_cast %19 : vector<8x32xf32> to vector<8x4x8xf32>
    %21 = tpu.transpose %20, [1, 0, 2] : vector<8x4x8xf32> -> vector<4x8x8xf32>
    "tpu.trace_start"() <{level = 10 : i32, message = "hqd,hkd->hqk"}> : () -> ()
    %cst_15 = arith.constant dense<0.000000e+00> : vector<4x8x8xf32>
    %22 = tpu.matmul %15, %18, %cst_15 {dimension_numbers = #tpu.dot_dimension_numbers<[2], [2], [1], [1], [0, 0, 0, 1, 1, 1], [0], [0]>} : vector<4x8x8xf32>, vector<4x8x8xf32>, vector<4x8x8xf32> -> vector<4x8x8xf32>
    "tpu.trace_stop"() : () -> ()
    %cst_16 = arith.constant dense<0xFF800000> : vector<4x8xf32>
    %23 = vector.multi_reduction <maximumf>, %22, %cst_16 [2] : vector<4x8x8xf32> to vector<4x8xf32>
    %24 = vector.shape_cast %23 : vector<4x8xf32> to vector<4x8x1xf32>
    %25 = vector.broadcast %24 : vector<4x8x1xf32> to vector<4x8x8xf32>
    %26 = arith.subf %22, %25 : vector<4x8x8xf32>
    %27 = math.exp %26 : vector<4x8x8xf32>
    %cst_17 = arith.constant dense<0.000000e+00> : vector<4x8xf32>
    %28 = vector.multi_reduction <add>, %27, %cst_17 [2] : vector<4x8x8xf32> to vector<4x8xf32>
    %29 = vector.shape_cast %28 : vector<4x8xf32> to vector<4x8x1xf32>
    %30 = vector.broadcast %29 : vector<4x8x1xf32> to vector<4x8x8xf32>
    %31 = arith.divf %27, %30 : vector<4x8x8xf32>
    "tpu.trace_start"() <{level = 10 : i32, message = "hqk,hkd->hqd"}> : () -> ()
    %cst_18 = arith.constant dense<0.000000e+00> : vector<4x8x8xf32>
    %32 = tpu.matmul %31, %21, %cst_18 {dimension_numbers = #tpu.dot_dimension_numbers<[2], [1], [1], [2], [0, 0, 0, 1, 1, 2], [0], [0]>} : vector<4x8x8xf32>, vector<4x8x8xf32>, vector<4x8x8xf32> -> vector<4x8x8xf32>
    "tpu.trace_stop"() : () -> ()
    %33 = tpu.transpose %32, [1, 0, 2] : vector<4x8x8xf32> -> vector<8x4x8xf32>
    %34 = vector.shape_cast %33 : vector<8x4x8xf32> to vector<8x32xf32>
    %cst_19 = arith.constant dense<0.000000e+00> : vector<8x32xf32>
    %35 = tpu.matmul %34, %4, %cst_19 {dimension_numbers = #tpu.dot_dimension_numbers<[1], [0], [0], [1], [0, 0, 1, 1], [], []>} : vector<8x32xf32>, vector<32x32xf32>, vector<8x32xf32> -> vector<8x32xf32>
    %36 = vector.broadcast %5 : vector<1x32xf32> to vector<8x32xf32>
    %37 = arith.addf %35, %36 : vector<8x32xf32>
    %38 = arith.addf %37, %1 : vector<8x32xf32>
    %cst_20 = arith.constant dense<0.000000e+00> : vector<8xf32>
    %39 = vector.multi_reduction <add>, %38, %cst_20 [1] : vector<8x32xf32> to vector<8xf32>
    %40 = vector.shape_cast %39 : vector<8xf32> to vector<8x1xf32>
    %cst_21 = arith.constant 3.200000e+01 : f32
    %41 = vector.broadcast %cst_21 : f32 to vector<8x1xf32>
    %42 = arith.divf %40, %41 : vector<8x1xf32>
    %43 = vector.broadcast %42 : vector<8x1xf32> to vector<8x32xf32>
    %44 = arith.subf %38, %43 : vector<8x32xf32>
    %45 = arith.mulf %44, %44 : vector<8x32xf32>
    %cst_22 = arith.constant dense<0.000000e+00> : vector<8xf32>
    %46 = vector.multi_reduction <add>, %45, %cst_22 [1] : vector<8x32xf32> to vector<8xf32>
    %47 = vector.shape_cast %46 : vector<8xf32> to vector<8x1xf32>
    %cst_23 = arith.constant 3.200000e+01 : f32
    %48 = vector.broadcast %cst_23 : f32 to vector<8x1xf32>
    %49 = arith.divf %47, %48 : vector<8x1xf32>
    %50 = vector.broadcast %42 : vector<8x1xf32> to vector<8x32xf32>
    %51 = arith.subf %38, %50 : vector<8x32xf32>
    %cst_24 = arith.constant 9.99999974E-6 : f32
    %52 = vector.broadcast %cst_24 : f32 to vector<8x1xf32>
    %53 = arith.addf %49, %52 : vector<8x1xf32>
    %54 = math.rsqrt %53 : vector<8x1xf32>
    %55 = vector.broadcast %54 : vector<8x1xf32> to vector<8x32xf32>
    %56 = arith.mulf %51, %55 : vector<8x32xf32>
    %57 = vector.broadcast %6 : vector<1x32xf32> to vector<8x32xf32>
    %58 = arith.mulf %56, %57 : vector<8x32xf32>
    %59 = vector.broadcast %7 : vector<1x32xf32> to vector<8x32xf32>
    %60 = arith.addf %58, %59 : vector<8x32xf32>
    %c0_25 = arith.constant 0 : index
    %c0_26 = arith.constant 0 : index
    %c0_27 = arith.constant 0 : index
    %61 = vector.load %arg8[%c0_25, %c0_26, %c0_27] : memref<1x8x32xf32, #tpu.memory_space<vmem>>, vector<1x8x32xf32>
    %62 = vector.shape_cast %61 : vector<1x8x32xf32> to vector<8x32xf32>
    %63 = vector.shape_cast %60 : vector<8x32xf32> to vector<1x8x32xf32>
    tpu.vector_store %arg8[%c0_25, %c0_26, %c0_27], %63 {strides = array<i32>} : memref<1x8x32xf32, #tpu.memory_space<vmem>>, vector<1x8x32xf32>,
    return
  }
  func.func @transform_0(%arg0: i32) -> (i32, i32, i32) {
    %c0_i32 = arith.constant 0 : i32
    %c0_i32_0 = arith.constant 0 : i32
    %c0_i32_1 = arith.constant 0 : i32
    return %arg0, %c0_i32, %c0_i32_0 : i32, i32, i32
  }
  func.func @transform_1(%arg0: i32) -> (i32, i32) {
    %c0_i32 = arith.constant 0 : i32
    %c0_i32_0 = arith.constant 0 : i32
    %c0_i32_1 = arith.constant 0 : i32
    return %c0_i32, %c0_i32_0 : i32, i32
  }
  func.func @transform_2(%arg0: i32) -> (i32, i32) {
    %c0_i32 = arith.constant 0 : i32
    %c0_i32_0 = arith.constant 0 : i32
    %c0_i32_1 = arith.constant 0 : i32
    return %c0_i32, %c0_i32_0 : i32, i32
  }
  func.func @transform_3(%arg0: i32) -> (i32, i32) {
    %c0_i32 = arith.constant 0 : i32
    %c0_i32_0 = arith.constant 0 : i32
    %c0_i32_1 = arith.constant 0 : i32
    return %c0_i32, %c0_i32_0 : i32, i32
  }
  func.func @transform_4(%arg0: i32) -> (i32, i32) {
    %c0_i32 = arith.constant 0 : i32
    %c0_i32_0 = arith.constant 0 : i32
    %c0_i32_1 = arith.constant 0 : i32
    return %c0_i32, %c0_i32_0 : i32, i32
  }
  func.func @transform_5(%arg0: i32) -> (i32, i32) {
    %c0_i32 = arith.constant 0 : i32
    %c0_i32_0 = arith.constant 0 : i32
    %c0_i32_1 = arith.constant 0 : i32
    return %c0_i32, %c0_i32_0 : i32, i32
  }
  func.func @transform_6(%arg0: i32) -> (i32, i32) {
    %c0_i32 = arith.constant 0 : i32
    %c0_i32_0 = arith.constant 0 : i32
    %c0_i32_1 = arith.constant 0 : i32
    return %c0_i32, %c0_i32_0 : i32, i32
  }
  func.func @transform_7(%arg0: i32) -> (i32, i32, i32) {
    %c0_i32 = arith.constant 0 : i32
    %c0_i32_0 = arith.constant 0 : i32
    %c0_i32_1 = arith.constant 0 : i32
    return %arg0, %c0_i32, %c0_i32_0 : i32, i32, i32
  }
}

</mosaic_0001>

<bundles_post_ra>
// kernel: tpu_custom_call.1
= control target key start
LH: loop header
LB: loop body
LE: loop exit
PB: predicated region body
PF: predicated region fallthrough
CT: control target
= control target key end

     0   :  { %12 = vsyncpa [#allocation3], 0  ;;  %s2746_s0 = inlined_call_operand.hbm [shape: f32[2,8,32], index: 0, kind: input, shape index: {}]   ;;  %s2747_s1 = inlined_call_operand.hbm [shape: f32[32,96], index: 1, kind: input, shape index: {}]   ;;  %s2748_s2 = inlined_call_operand.vmem [shape: f32[1,96], index: 2, kind: input, shape index: {}]   ;;  %s2749_s3 = inlined_call_operand.hbm [shape: f32[32,32], index: 3, kind: input, shape index: {}]   ;;  %s2750_s4 = inlined_call_operand.vmem [shape: f32[1,32], index: 4, kind: input, shape index: {}]   ;;  %s2751_s5 = inlined_call_operand.vmem [shape: f32[1,32], index: 5, kind: input, shape index: {}]   ;;  %s2752_s6 = inlined_call_operand.vmem [shape: f32[1,32], index: 6, kind: input, shape index: {}]   ;;  %s2753_s7 = inlined_call_operand.hbm [shape: f32[2,8,32], index: 7, kind: output, shape index: {}]  }
   0x1   :  { %14 = vsyncpa [#allocation3 + $0x1], 0 }
   0x2   :  { %15 = vsyncpa [#allocation6], 0 }
   0x3   :  { %16 = vsyncpa [#allocation4], 0 }
   0x4   :  { %18 = vsyncpa [#allocation4 + $0x1], 0  ;;  %s2331_s24 = smov 0   ;;  %s2333_s25 = smov 0  }
   0x5   :  { %s2335_s26 = smov 0   ;;  %s2337_s27 = smov 0  }
   0x6 LB: > { %s2352_s28 = sadd.s32 4294967295, %s2270_s27   ;;  %s1872_s29 = sadd.s32 4294967294, %s2270_s27   ;;  %s2270_s27 = sphi %s2337_s27, %s2773_s27   ;;  %s2266_s26 = sphi %s2335_s26, %s2772_s26   ;;  %s2262_s25 = sphi %s2333_s25, %s2771_s25   ;;  %s2258_s24 = sphi %s2331_s24, %s2770_s24  }
   0x7   : > { %p44_p0 = scmp.ne.s32.totalorder %s2262_s25, %s2258_s24  ;;  %p2754_p1 = scmp.eq.s32.totalorder %s2352_s28, 0 }
   0x8   : > { %p200_p3 = scmp.eq.s32.totalorder %s1872_s29, 1  ;;  %p1873_p5 = scmp.ge.s32.totalorder %s2270_s27, 1 }
   0x9   : > { %p2361_p4 = por %p2754_p1, %p44_p0  ;;  %p207_p7 = scmp.lt.s32.totalorder %s2270_s27, 3 }
   0xa   : > { %p2366_p6 = por %p200_p3, %p44_p0  ;;  %s2272_s10 = smov [#allocation5]  }
   0xb   : > { %s2757_s30 = scalar_select %p2361_p4, 1, 0 }
   0xc   : > { %s2758_s8 = scalar_select %p2366_p6, 1, 0 }
   0xd   : > { %p2371_p8 = pnand %p1873_p5, %p207_p7  ;;  %s219_s11 = sshll.u32 %s2272_s10, 4  ;;  %s2375_s11 = int_to_ptr.vmem [resolvable:$true] %s219_s11 }
   0xe   : > { %s2273_s13 = smov [#allocation7]   ;;  %s2114_s17 = scalar_lea.hbm %s2747_s1, 512 }
   0xf   : > { %p2026_p9 = pneg %p2371_p8  ;;  %s235_s14 = sshll.u32 %s2273_s13, 4  ;;  %s2386_s14 = int_to_ptr.vmem [resolvable:$true] %s235_s14 }
  0x10   : > { %p2115_p12 = scmp.ne.s32.totalorder %s2747_s1, %s2114_s17  ;;  %p2121_p5 = scmp.lt.u32.totalorder %s2114_s17, %s2747_s1 }
  0x11   : > { %p2382_p11 = pnand %p2026_p9, %p2754_p1 }
  0x13   : > { %p2116_p13 = pneg %p2382_p11 }
  0x15   : > { %p2117_p0 = pnand %p2116_p13, %p2115_p12 }
  0x17   : > { %p2118_p3 = pneg %p2117_p0 }
  0x19   : > { %p2123_p7 = pnand %p2121_p5, %p2118_p3 }
  0x1b   : > { %2126 = shalt.err (!%p2123_p7)
}
  0x1c   : > { %s2127_s22 = scalar_lea.vmem %s2375_s11, 512  ;;  %p2135_p2 = scmp.lt.s32.totalorder %s2375_s11, %s2375_s11 }
  0x1d   : > { %p2128_p9 = scmp.ne.s32.totalorder %s2375_s11, %s2127_s22  ;;  %p2136_p12 = scmp.lt.s32.totalorder %s2127_s22, %s2127_s22 }
  0x1f   : > { %p2130_p10 = pnand %p2128_p9, %p2116_p13  ;;  %p2137_p0 = por %p2136_p12, %p2135_p2 }
  0x21   : > { %p2131_p1 = pneg %p2130_p10 }
  0x23   : > { %p2138_p6 = pnand %p2137_p0, %p2131_p1 }
  0x25   : > { %2141 = shalt.err (!%p2138_p6)
}
  0x26   : > { %s2274_s23 = smov 128   ;;  %s2275_s29 = smov 8  }
  0x27   : > { %2029 = dma.hbm_to_vmem [thread:$0]  (!%p2382_p11), %s2747_s1, 512, %s2375_s11, [#allocation6], %s2274_s23, %s2274_s23, %s2275_s29  }
  0x28   : > { %s2142_s17 = scalar_lea.hbm %s2749_s3, 512 }
  0x29   : > { %p2143_p2 = scmp.ne.s32.totalorder %s2749_s3, %s2142_s17  ;;  %p2149_p10 = scmp.lt.u32.totalorder %s2142_s17, %s2749_s3 }
  0x2b   : > { %p2145_p1 = pnand %p2143_p2, %p2116_p13 }
  0x2d   : > { %p2146_p6 = pneg %p2145_p1 }
  0x2f   : > { %p2151_p3 = pnand %p2149_p10, %p2146_p6 }
  0x31   : > { %2154 = shalt.err (!%p2151_p3)
}
  0x32   : > { %s2155_s11 = scalar_lea.vmem %s2386_s14, 512  ;;  %p2163_p12 = scmp.lt.s32.totalorder %s2386_s14, %s2386_s14 }
  0x33   : > { %p2156_p5 = scmp.ne.s32.totalorder %s2386_s14, %s2155_s11  ;;  %p2164_p0 = scmp.lt.s32.totalorder %s2155_s11, %s2155_s11 }
  0x35   : > { %p2158_p7 = pnand %p2156_p5, %p2116_p13  ;;  %p2165_p2 = por %p2164_p0, %p2163_p12 }
  0x37   : > { %p2159_p9 = pneg %p2158_p7 }
  0x39   : > { %p2166_p1 = pnand %p2165_p2, %p2159_p9 }
  0x3b   : > { %2169 = shalt.err (!%p2166_p1)
}
  0x3c   : > { %2032 = dma.hbm_to_vmem [thread:$0]  (!%p2382_p11), %s2749_s3, 512, %s2386_s14, [#allocation6], %s2274_s23, %s2274_s23, %s2275_s29  }
  0x3d   : > { %s2441_s13 = sadd.s32 1, %s2270_s27   ;;  %s31_s12 = sadd.s32 1, %s2266_s26 }
  0x3e   : > { %s28_s15 = ssub.s32 %s2270_s27, %s2441_s13  ;;  %p38_p13 = scmp.ne.s32.totalorder %s2266_s26, %s2262_s25 }
  0x3f   : > { %p29_p6 = scmp.eq.s32.totalorder %s28_s15, 0  ;;  %p39_p10 = scmp.eq.s32.totalorder %s2270_s27, 0 }
  0x40   : > { %p2761_p3 = scmp.eq.s32.totalorder %s2352_s28, 1  ;;  %p2043_p7 = scmp.lt.s32.totalorder %s2270_s27, 2 }
  0x41   : > { %s2457_s17 = scalar_select %p29_p6, %s2266_s26, %s31_s12  }
  0x42   : > { %p2451_p5 = por %p2761_p3, %p38_p13  ;;  %p40_p9 = por %p39_p10, %p38_p13 }
  0x43   : > { %s258_s18 = sand.u32 1, %s2266_s26   ;;  %s1878_s14 = sshll.u32 %s2270_s27, 7 }
  0x44   : > { %s2762_s16 = scalar_select %p2451_p5, 1, 0 }
  0x45   : > { %s1877_s19 = sshll.u32 %s258_s18, 3  ;;  %s2464_s20 = scalar_lea.hbm %s2746_s0, %s1878_s14 }
  0x46   : > { %s262_s21 = scalar_lea.vmem [#allocation2], %s1877_s19  ;;  %p2468_p11 = pnand %p2043_p7, %p40_p9 }
  0x47   : > { %s269_s11 = sshll.u32 %s262_s21, 4  ;;  %s259_s10 = scalar_lea.sflag [#allocation3], %s258_s18  ;;  %s2466_s11 = int_to_ptr.vmem [resolvable:$true] %s269_s11 }
  0x48   : > { %s2170_s12 = scalar_lea.hbm %s2464_s20, 128  ;;  %p2172_p0 = pneg %p2468_p11 }
  0x49   : > { %p2171_p12 = scmp.ne.s32.totalorder %s2464_s20, %s2170_s12  ;;  %s2175_s14 = scalar_lea.hbm %s2746_s0, 256 }
  0x4a   : > { %p2176_p13 = scmp.lt.u32.totalorder %s2464_s20, %s2746_s0  ;;  %p2177_p6 = scmp.lt.u32.totalorder %s2175_s14, %s2170_s12 }
  0x4b   : > { %p2173_p2 = pnand %p2172_p0, %p2171_p12  ;;  %p2179_p3 = scmp.lt.u32.totalorder %s2170_s12, %s2464_s20 }
  0x4c   : > { %p2178_p10 = por %p2177_p6, %p2176_p13 }
  0x4d   : > { %p2174_p1 = pneg %p2173_p2 }
  0x4e   : > { %p2180_p7 = por %p2179_p3, %p2178_p10 }
  0x50   : > { %p2181_p9 = pnand %p2180_p7, %p2174_p1 }
  0x52   : > { %2184 = shalt.err (!%p2181_p9)
}
  0x53   : > { %s2185_s18 = scalar_lea.vmem %s2466_s11, 128  ;;  %s2276_s21 = smov [#allocation2]  }
  0x54   : > { %p2186_p12 = scmp.ne.s32.totalorder %s2466_s11, %s2185_s18  ;;  %s2190_s15 = sshll.u32 %s2276_s21, 4  ;;  %s2191_s15 = int_to_ptr.vmem [resolvable:$false] %s2190_s15 }
  0x55   : > { %s2192_s19 = scalar_lea.vmem %s2191_s15, 256  ;;  %p2193_p4 = scmp.lt.s32.totalorder %s2466_s11, %s2191_s15 }
  0x56   : > { %p2188_p2 = pnand %p2186_p12, %p2172_p0  ;;  %p2194_p13 = scmp.lt.s32.totalorder %s2192_s19, %s2185_s18 }
  0x58   : > { %p2189_p5 = pneg %p2188_p2  ;;  %p2195_p6 = por %p2194_p13, %p2193_p4 }
  0x5a   : > { %p2196_p10 = pnand %p2195_p6, %p2189_p5 }
  0x5c   : > { %2199 = shalt.err (!%p2196_p10)
}
  0x5d   : > { %2036 = dma.hbm_to_vmem [thread:$0]  (!%p2468_p11), %s2464_s20, 128, %s2466_s11, %s259_s10  }
  0x5e   : > { %278 = sbr.rel (%p2371_p8) target bundleno = 2031 (0x7ef), region = 48  ;;  %s2500_s12 = sand.u32 (!%p2371_p8), 1, %s2262_s25  }
  0x5f   : > { %s1880_s14 = sshll.u32 (!%p2371_p8), %s2500_s12, 3  ;;  %s281_s23 = scalar_lea.sflag (!%p2371_p8), [#allocation3], %s2500_s12 }
  0x60   : > { %s284_s29 = scalar_lea.vmem (!%p2371_p8), [#allocation2], %s1880_s14  ;;  %p2764_p4 = scmp.ne.s32.totalorder (!%p2371_p8), %s2757_s30, 0 }
  0x65   : > { %2245 = dma.done.wait (%p2764_p4), %s281_s23, 128  }
  0x66   : > { %2247 = vsyncadd (%p2764_p4), %s281_s23, 4294967168  ;;  %p2765_p5 = scmp.eq.s32.totalorder %s2352_s28, 0 }
  0x68   : > { %2249 = dma.done.wait (%p2765_p5), [#allocation6], 1024   ;;  %p2766_p8 = pmov %p2765_p5 }
  0x69   : > { %v2277_v0 = vmov 0.0|0.0   ;;  %vm2278_vm0 = vmmov 0   ;;  %v2279_v1 = vmov 0.0   ;;  %v324_v2 = vld [vmem:[#allocation5] sm:$0xff]  ;;  %v325_v3 = vld [vmem:[#allocation5 + $0x8] sm:$0xff]  ;;  %v326_v4 = vld [vmem:[#allocation5 + $0x10] sm:$0xff]  ;;  %v432_v20 = vlaneseq }
  0x6a   : > { %2251 = vsyncadd (%p2766_p8), [#allocation6], 4294966272  ;;  %2002 = vmatprep.subr.bf16.mxu0 %v2277_v0  ;;  %1948 = vmatprep.mubr.msk.f32.mxu0 %vm2278_vm0, %v2279_v1  ;;  %v2003_v5 = vpack.c.bf16 %v325_v3, %v324_v2  ;;  %v327_v6 = vld [vmem:[#allocation5 + $0x18] sm:$0xff]  ;;  %vm342_vm1 = vcmask 261120   ;;  %v1884_v9 = vld [vmem:[%s2748_s2] ss:$0 sm:$0xff] }
  0x6b   : > { %1951 = vmatprep.subr.mxu1 %v2279_v1  ;;  %1953 = vmatprep.mubr.msk.f32.mxu1 %vm2278_vm0, %v2279_v1  ;;  %v2006_v7 = vpack.c.bf16 %v327_v6, %v326_v4  ;;  %v2521_v8 = vld [vmem:[%s284_s29] sm:$0xff]  ;;  %s2280_s20 = smov 104   ;;  %s2281_s11 = smov 120   ;;  %v2284_v18 = vmov 1983009808   ;;  %v433_v24 = vshrl.u32 %v432_v20, 7 }
  0x6c   : > { %2004 = vmatpush3.bf16.msra.mxu0 %v2003_v5  ;;  %s2282_s22 = smov 96   ;;  %s2283_s10 = smov 112   ;;  %v430_v19 = vunpack.c.l.s4 %v2284_v18  ;;  %v2285_v21 = vmov 1934713408   ;;  %vm866_vm2 = vcmask 64512   ;;  %vm1656_vm3 = vcmask 130048  }
  0x6d   : > { %2005 = vmatprep.subr.bf16.mxu0 %v2277_v0  ;;  %v462_v22 = vunpack.c.l.s4 %v2285_v21  ;;  %s2286_s18 = smov 64   ;;  %s2287_s21 = smov 16   ;;  %vm1658_vm4 = vcmask 195584  }
  0x6e   : > { %v431_v23 = vunpack.c.0.s8 %v430_v19  ;;  %s2288_s15 = smov 8   ;;  %s2289_s19 = smov 24  }
  0x6f   : > { %v463_v27 = vunpack.c.0.s8 %v462_v22  ;;  %s1770_s23 = scalar_lea.sflag [#allocation4], %s2500_s12  ;;  %p2767_p0 = scmp.ne.s32.totalorder %s2762_s16, 0 }
  0x70   : > { %2007 = vmatpush3.bf16.msra.mxu0 %v2006_v7  ;;  %v2547_v28 = vsub.s32 %v431_v23, %v433_v24 }
  0x71   : > { %1971 = vmatprep.subr.mxu0 %v2279_v1  ;;  %v2549_v35 = vsub.s32 %v463_v27, %v433_v24 }
  0x73   : > { %1949 = vmatmul.mubr.msk.f32.vlgmr.msra.gmra.mrb[0].mxu0 %vm342_vm1, %v2521_v8 }
  0x74   : > { %1973 = vmatprep.mubr.msk.f32.mxu0 %vm2278_vm0, %v2279_v1 }
 0x146   : > { %v412_v10 = vpop.f32.mrb[0].mxu0 }
 0x147   : > { %v2531_v11 = vadd.f32 %v1884_v9, %v412_v10  ;;  %v1950_v12 = vpop.f32.mrb[1].mxu0 }
 0x149   : > { %568 = vrot.lane.b32.xlu1 %v2531_v11, %s2280_s20  ;;  %564 = vrot.lane.b32.xlu0 %v2531_v11, %s2281_s11  ;;  %v416_v13 = vmul.f32 0.35355338, %v2531_v11 }
 0x14d   : > { %570 = vrot.lane.b32.xlu1 %v2531_v11, %s2282_s22  ;;  %566 = vrot.lane.b32.xlu0 %v2531_v11, %s2283_s10 }
 0x151   : > { %418 = vrot.lane.b32.xlu1 %v416_v13, %s2281_s11 }
 0x1bb   : > { %v2538_v14 = vpop.permute.xlu0 %564  ;;  %v2541_v15 = vpop.permute.xlu1 %568 }
 0x1bc   : > { %572 = vrot.lane.b32.xlu0 %v2538_v14, %s2282_s22 }
 0x1bf   : > { %v2543_v16 = vpop.permute.xlu0 %566  ;;  %v571_v17 = vpop.permute.xlu1 %570 }
 0x1c0   : > { %576 = vrot.lane.b32.xlu0 %v2541_v15, %s2282_s22  ;;  %574 = vrot.lane.b32.xlu1 %v2543_v16, %s2282_s22  ;;  %s1911_s22 = sshll.u32 %s2352_s28, 7  ;;  %s2290_s28 = smov [#allocation8]  }
 0x1c3   : > { %v419_v25 = vpop.permute.xlu1 %418 }
 0x1c4   : > { %421 = vrot.lane.b32.xlu0 %v416_v13, %s2283_s10  ;;  %424 = vrot.lane.b32.xlu1 %v416_v13, %s2280_s20  ;;  %s322_s10 = scalar_lea.vmem [#allocation8], %s1880_s14  ;;  %s2204_s14 = sshll.u32 %s2290_s28, 4  ;;  %s2205_s14 = int_to_ptr.vmem [resolvable:$false] %s2204_s14 }
 0x1c5   : > { %s2206_s30 = scalar_lea.vmem %s2205_s14, 256 }
 0x22e   : > { %v573_v26 = vpop.permute.xlu0 %572 }
 0x232   : > { %v577_v29 = vpop.permute.xlu0 %576  ;;  %v575_v30 = vpop.permute.xlu1 %574 }
 0x233   : > { %v598_v31 = vcombine.low %v573_v26, %v577_v29  ;;  %v599_v32 = vcombine.high %v573_v26, %v577_v29  ;;  %v582_v33 = vcombine.low %v571_v17, %v575_v30  ;;  %v583_v34 = vcombine.high %v571_v17, %v575_v30 }
 0x235   : > { %v606_v36 = vrot.slane %v598_v31, %v2547_v28  ;;  %v613_v37 = vrot.slane %v599_v32, %v2547_v28  ;;  %v590_v38 = vrot.slane %v582_v33, %v2547_v28  ;;  %v597_v39 = vrot.slane %v583_v34, %v2547_v28 }
 0x236   : > { %v422_v40 = vpop.permute.xlu0 %421  ;;  %v425_v41 = vpop.permute.xlu1 %424 }
 0x237   : > { %v614_v42 = vcombine.low %v590_v38, %v606_v36  ;;  %v615_v43 = vcombine.high %v590_v38, %v606_v36  ;;  %v630_v44 = vcombine.low %v597_v39, %v613_v37  ;;  %v631_v45 = vcombine.high %v597_v39, %v613_v37 }
 0x238   : > { %v427_v46 = vcombine.low %v416_v13, %v422_v40  ;;  %v428_v47 = vcombine.high %v416_v13, %v422_v40  ;;  %v443_v48 = vcombine.low %v419_v25, %v425_v41  ;;  %v444_v49 = vcombine.high %v419_v25, %v425_v41 }
 0x239   : > { %v622_v50 = vrot.slane %v614_v42, %v2549_v35  ;;  %v629_v51 = vrot.slane %v615_v43, %v2549_v35  ;;  %v638_v52 = vrot.slane %v630_v44, %v2549_v35  ;;  %v645_v53 = vrot.slane %v631_v45, %v2549_v35 }
 0x23a   : > { %v435_v54 = vrot.slane %v427_v46, %v2547_v28  ;;  %v442_v55 = vrot.slane %v428_v47, %v2547_v28  ;;  %v451_v56 = vrot.slane %v443_v48, %v2547_v28  ;;  %v458_v57 = vrot.slane %v444_v49, %v2547_v28 }
 0x23b   : > { %v650_v58 = vcombine.low %v622_v50, %v629_v51  ;;  %v1888_v59 = vcombine.high %v622_v50, %v629_v51  ;;  %v666_v60 = vcombine.low %v638_v52, %v645_v53  ;;  %v1889_v61 = vcombine.high %v638_v52, %v645_v53 }
 0x23c   : > { %v459_v62 = vcombine.low %v435_v54, %v451_v56  ;;  %v460_v63 = vcombine.high %v435_v54, %v451_v56  ;;  %v475_v2 = vcombine.low %v442_v55, %v458_v57  ;;  %v476_v3 = vcombine.high %v442_v55, %v458_v57 }
 0x23d   : > { %v657_v4 = vrot.slane %v650_v58, %v2547_v28  ;;  %v665_v5 = vrot.slane %v1888_v59, %v2547_v28  ;;  %v673_v6 = vrot.slane %v666_v60, %v2547_v28  ;;  %v681_v7 = vrot.slane %v1889_v61, %v2547_v28 }
 0x23e   : > { %v467_v9 = vrot.slane %v459_v62, %v2549_v35  ;;  %v474_v10 = vrot.slane %v460_v63, %v2549_v35  ;;  %v483_v12 = vrot.slane %v475_v2, %v2549_v35  ;;  %v490_v13 = vrot.slane %v476_v3, %v2549_v35 }
 0x23f   : > { %v682_v17 = vcombine.low %v657_v4, %v665_v5  ;;  %v698_v18 = vcombine.low %v673_v6, %v681_v7  ;;  %v683_v33 = vcombine.high %v657_v4, %v665_v5  ;;  %v699_v34 = vcombine.high %v673_v6, %v681_v7 }
 0x240   : > { %v495_v19 = vcombine.low %v467_v9, %v474_v10  ;;  %v1886_v20 = vcombine.high %v467_v9, %v474_v10  ;;  %v511_v21 = vcombine.low %v483_v12, %v490_v13  ;;  %v1887_v22 = vcombine.high %v483_v12, %v490_v13 }
 0x241   : > { %v690_v23 = vrot.slane %v682_v17, %v2549_v35  ;;  %v706_v24 = vrot.slane %v698_v18, %v2549_v35  ;;  %v697_v42 = vrot.slane %v683_v33, %v2549_v35  ;;  %v713_v43 = vrot.slane %v699_v34, %v2549_v35 }
 0x242   : > { %v502_v25 = vrot.slane %v495_v19, %v2547_v28  ;;  %v510_v26 = vrot.slane %v1886_v20, %v2547_v28  ;;  %v518_v27 = vrot.slane %v511_v21, %v2547_v28  ;;  %v526_v29 = vrot.slane %v1887_v22, %v2547_v28 }
 0x243   : > { %v714_v30 = vcombine.low %v690_v23, %v706_v24  ;;  %v715_v41 = vcombine.high %v690_v23, %v706_v24  ;;  %v716_v47 = vcombine.low %v697_v42, %v713_v43  ;;  %v717_v49 = vcombine.high %v697_v42, %v713_v43 }
 0x244   : > { %v527_v31 = vcombine.low %v502_v25, %v510_v26  ;;  %v543_v32 = vcombine.low %v518_v27, %v526_v29  ;;  %v528_v38 = vcombine.high %v502_v25, %v510_v26  ;;  %v544_v39 = vcombine.high %v518_v27, %v526_v29 }
 0x245   : > { %1952 = vmatpush3.xpose.msk.msra.mxu1 %vm866_vm2, %v714_v30 }
 0x246   : > { %1956 = vmatprep.subr.mxu1 %v2279_v1  ;;  %v535_v36 = vrot.slane %v527_v31, %v2549_v35  ;;  %v551_v37 = vrot.slane %v543_v32, %v2549_v35  ;;  %v542_v45 = vrot.slane %v528_v38, %v2549_v35  ;;  %v558_v46 = vrot.slane %v544_v39, %v2549_v35 }
 0x248   : > { %v559_v40 = vcombine.low %v535_v36, %v551_v37  ;;  %v560_v44 = vcombine.high %v535_v36, %v551_v37  ;;  %v561_v48 = vcombine.low %v542_v45, %v558_v46  ;;  %v562_v50 = vcombine.high %v542_v45, %v558_v46 }
 0x24a   : > { %1954 = vmatmul.mubr.msk.f32.vlgmr.msra.gmra.mrb[0].mxu1 %vm866_vm2, %v559_v40 }
 0x24b   : > { %1957 = vmatpush3.xpose.msk.msra.mxu1 %vm866_vm2, %v715_v41  ;;  %1958 = vmatprep.mubr.msk.f32.mxu1 %vm2278_vm0, %v2279_v1 }
 0x24c   : > { %1961 = vmatprep.subr.mxu1 %v2279_v1 }
 0x24e   : > { %1959 = vmatmul.mubr.msk.f32.vlgmr.msra.gmra.mrb[2].mxu1 %vm866_vm2, %v560_v44 }
 0x24f   : > { %1962 = vmatpush3.xpose.msk.msra.mxu1 %vm866_vm2, %v716_v47  ;;  %1963 = vmatprep.mubr.msk.f32.mxu1 %vm2278_vm0, %v2279_v1 }
 0x250   : > { %1966 = vmatprep.subr.mxu1 %v2279_v1 }
 0x252   : > { %1964 = vmatmul.mubr.msk.f32.vlgmr.msra.gmra.mrb[4].mxu1 %vm866_vm2, %v561_v48 }
 0x253   : > { %1967 = vmatpush3.xpose.msk.msra.mxu1 %vm866_vm2, %v717_v49  ;;  %1968 = vmatprep.mubr.msk.f32.mxu1 %vm2278_vm0, %v2279_v1 }
 0x254   : > { %1976 = vmatprep.subr.mxu1 %v2279_v1 }
 0x256   : > { %1969 = vmatmul.mubr.msk.f32.vlgmr.msra.gmra.mrb[6].mxu1 %vm866_vm2, %v562_v50 }
 0x257   : > { %1978 = vmatprep.mubr.msk.f32.mxu1 %vm2278_vm0, %v2279_v1 }
 0x31d   : > { %v939_v51 = vpop.f32.mrb[0].mxu1 }
 0x31e   : > { %v1955_v52 = vpop.f32.mrb[1].mxu1  ;;  %v1171_v53 = vsel %vm866_vm2, %v939_v51, -inf }
 0x31f   : > { %1172 = vmax.xlane.f32.xlu0 %v1171_v53 }
 0x321   : > { %v1015_v54 = vpop.f32.mrb[2].mxu1 }
 0x322   : > { %v1960_v55 = vpop.f32.mrb[3].mxu1  ;;  %v1174_v56 = vsel %vm866_vm2, %v1015_v54, -inf }
 0x323   : > { %1175 = vmax.xlane.f32.xlu1 %v1174_v56 }
 0x325   : > { %v1091_v57 = vpop.f32.mrb[4].mxu1 }
 0x326   : > { %v1965_v58 = vpop.f32.mrb[5].mxu1  ;;  %v1177_v59 = vsel %vm866_vm2, %v1091_v57, -inf }
 0x327   : > { %1178 = vmax.xlane.f32.xlu0 %v1177_v59 }
 0x329   : > { %v1167_v60 = vpop.f32.mrb[6].mxu1 }
 0x32a   : > { %v1970_v61 = vpop.f32.mrb[7].mxu1  ;;  %v1180_v62 = vsel %vm866_vm2, %v1167_v60, -inf }
 0x32b   : > { %1181 = vmax.xlane.f32.xlu0 %v1180_v62 }
 0x334   : > { %718 = vrot.lane.b32.xlu1 %v2531_v11, %s2286_s18 }
 0x3ac   : > { %v1173_v63 = vpop.xlane.xlu0 %1172 }
 0x3ad   : > { %v1183_v2 = vsub.f32 %v939_v51, %v1173_v63 }
 0x3af   : > { %v1187_v3 = vmul.f32 1.442695, %v1183_v2 }
 0x3b0   : > { %v1176_v4 = vpop.xlane.xlu1 %1175 }
 0x3b1   : > { %2096 = vpow2.f32 %v1187_v3  ;;  %v1184_v5 = vsub.f32 %v1015_v54, %v1176_v4 }
 0x3b3   : > { %v1189_v6 = vmul.f32 1.442695, %v1184_v5 }
 0x3b4   : > { %v1179_v7 = vpop.xlane.xlu0 %1178  ;;  %v719_v25 = vpop.permute.xlu1 %718 }
 0x3b5   : > { %2098 = vpow2.f32 %v1189_v6  ;;  %v1185_v9 = vsub.f32 %v1091_v57, %v1179_v7 }
 0x3b7   : > { %v1191_v10 = vmul.f32 1.442695, %v1185_v9 }
 0x3b8   : > { %v1182_v12 = vpop.xlane.xlu0 %1181 }
 0x3b9   : > { %2100 = vpow2.f32 %v1191_v10  ;;  %v1186_v13 = vsub.f32 %v1167_v60, %v1182_v12 }
 0x3bb   : > { %v2609_v17 = vpop.eup %2096  ;;  %v1193_v18 = vmul.f32 1.442695, %v1186_v13 }
 0x3bc   : > { %v1195_v11 = vsel %vm866_vm2, %v2609_v17, 0.0 }
 0x3bd   : > { %2102 = vpow2.f32 %v1193_v18  ;;  %1196 = vadd.xlane.f32.xlu1 %v1195_v11 }
 0x3bf   : > { %v2613_v19 = vpop.eup %2098 }
 0x3c0   : > { %v1198_v20 = vsel %vm866_vm2, %v2613_v19, 0.0 }
 0x3c1   : > { %1199 = vadd.xlane.f32.xlu0 %v1198_v20 }
 0x3c3   : > { %v2617_v21 = vpop.eup %2100 }
 0x3c4   : > { %v1201_v22 = vsel %vm866_vm2, %v2617_v21, 0.0 }
 0x3c5   : > { %1202 = vadd.xlane.f32.xlu1 %v1201_v22 }
 0x3c7   : > { %v2621_v23 = vpop.eup %2102 }
 0x3c8   : > { %v1204_v24 = vsel %vm866_vm2, %v2621_v23, 0.0 }
 0x3c9   : > { %1205 = vadd.xlane.f32.xlu0 %v1204_v24 }
 0x3d6   : > { %722 = vrot.lane.b32.xlu1 %v2543_v16, %s2286_s18 }
 0x3da   : > { %724 = vrot.lane.b32.xlu1 %v2541_v15, %s2286_s18 }
 0x3df   : > { %720 = vrot.lane.b32.xlu0 %v2538_v14, %s2286_s18  ;;  %s1783_s18 = sshll.u32 %s322_s10, 4  ;;  %s2703_s18 = int_to_ptr.vmem [resolvable:$true] %s1783_s18 }
 0x3e0   : > { %s2200_s29 = scalar_lea.vmem %s2703_s18, 128  ;;  %p2207_p7 = scmp.lt.s32.totalorder %s2703_s18, %s2205_s14 }
 0x3e1   : > { %p2201_p11 = scmp.ne.s32.totalorder %s2703_s18, %s2200_s29  ;;  %p2208_p9 = scmp.lt.s32.totalorder %s2206_s30, %s2200_s29 }
 0x3e3   : > { %p2202_p1 = pnand %p2201_p11, %p2767_p0  ;;  %p2209_p12 = por %p2208_p9, %p2207_p7 }
 0x3e5   : > { %p2203_p3 = pneg %p2202_p1 }
 0x3e7   : > { %p2210_p2 = pnand %p2209_p12, %p2203_p3 }
 0x44a   : > { %v1197_v26 = vpop.xlane.xlu1 %1196 }
 0x44b   : > { %2104 = vrcp.f32 %v1197_v26 }
 0x44e   : > { %v1200_v27 = vpop.xlane.xlu0 %1199 }
 0x44f   : > { %2106 = vrcp.f32 %v1200_v27 }
 0x452   : > { %v1203_v29 = vpop.xlane.xlu1 %1202 }
 0x453   : > { %2108 = vrcp.f32 %v1203_v29 }
 0x455   : > { %v2105_v56 = vpop.eup %2104 }
 0x456   : > { %v723_v30 = vpop.permute.xlu1 %722  ;;  %v1206_v31 = vpop.xlane.xlu0 %1205  ;;  %v1208_v9 = vmul.f32 %v2105_v56, %v2609_v17  ;;  %v329_v17 = vld [vmem:[#allocation7] sm:$0xff] }
 0x457   : > { %v730_v32 = vcombine.low %v719_v25, %v723_v30  ;;  %v731_v33 = vcombine.high %v719_v25, %v723_v30  ;;  %2110 = vrcp.f32 %v1206_v31 }
 0x459   : > { %v738_v16 = vrot.slane %v730_v32, %v2547_v28  ;;  %v745_v15 = vrot.slane %v731_v33, %v2547_v28  ;;  %v2107_v61 = vpop.eup %2106 }
 0x45a   : > { %v725_v34 = vpop.permute.xlu1 %724  ;;  %v721_v36 = vpop.permute.xlu0 %720  ;;  %v1210_v10 = vmul.f32 %v2107_v61, %v2613_v19  ;;  %v330_v19 = vld [vmem:[#allocation7 + $0x8] sm:$0xff] }
 0x45b   : > { %v746_v37 = vcombine.low %v721_v36, %v725_v34  ;;  %v747_v38 = vcombine.high %v721_v36, %v725_v34  ;;  %v2009_v20 = vpack.c.bf16 %v330_v19, %v329_v17 }
 0x45d   : > { %v754_v39 = vrot.slane %v746_v37, %v2547_v28  ;;  %v761_v14 = vrot.slane %v747_v38, %v2547_v28  ;;  %v2109_v2 = vpop.eup %2108 }
 0x45e   : > { %v1212_v18 = vmul.f32 %v2109_v2, %v2617_v21 }
 0x45f   : > { %v762_v40 = vcombine.low %v738_v16, %v754_v39  ;;  %v763_v41 = vcombine.high %v738_v16, %v754_v39  ;;  %v778_v42 = vcombine.low %v745_v15, %v761_v14  ;;  %v779_v43 = vcombine.high %v745_v15, %v761_v14  ;;  %v331_v39 = vld [vmem:[#allocation7 + $0x10] sm:$0xff]  ;;  %v332_v14 = vld [vmem:[#allocation7 + $0x18] sm:$0xff] }
 0x461   : > { %v770_v44 = vrot.slane %v762_v40, %v2549_v35  ;;  %v777_v45 = vrot.slane %v763_v41, %v2549_v35  ;;  %v786_v46 = vrot.slane %v778_v42, %v2549_v35  ;;  %v793_v47 = vrot.slane %v779_v43, %v2549_v35  ;;  %v2111_v7 = vpop.eup %2110 }
 0x462   : > { %v1214_v11 = vmul.f32 %v2111_v7, %v2621_v23 }
 0x463   : > { %v798_v48 = vcombine.low %v770_v44, %v777_v45  ;;  %v1890_v49 = vcombine.high %v770_v44, %v777_v45  ;;  %v814_v50 = vcombine.low %v786_v46, %v793_v47  ;;  %v1891_v51 = vcombine.high %v786_v46, %v793_v47 }
 0x464   : > { %v2012_v44 = vpack.c.bf16 %v332_v14, %v331_v39 }
 0x465   : > { %v805_v52 = vrot.slane %v798_v48, %v2547_v28  ;;  %v813_v53 = vrot.slane %v1890_v49, %v2547_v28  ;;  %v821_v54 = vrot.slane %v814_v50, %v2547_v28  ;;  %v829_v55 = vrot.slane %v1891_v51, %v2547_v28 }
 0x467   : > { %v830_v57 = vcombine.low %v805_v52, %v813_v53  ;;  %v846_v58 = vcombine.low %v821_v54, %v829_v55  ;;  %v831_v59 = vcombine.high %v805_v52, %v813_v53  ;;  %v847_v60 = vcombine.high %v821_v54, %v829_v55 }
 0x469   : > { %v838_v62 = vrot.slane %v830_v57, %v2549_v35  ;;  %v854_v63 = vrot.slane %v846_v58, %v2549_v35  ;;  %v845_v3 = vrot.slane %v831_v59, %v2549_v35  ;;  %v861_v4 = vrot.slane %v847_v60, %v2549_v35 }
 0x46b   : > { %v862_v5 = vcombine.low %v838_v62, %v854_v63  ;;  %v863_v6 = vcombine.high %v838_v62, %v854_v63  ;;  %v864_v12 = vcombine.low %v845_v3, %v861_v4  ;;  %v865_v13 = vcombine.high %v845_v3, %v861_v4 }
 0x46d   : > { %1972 = vmatpush3.msra.mxu0 %v862_v5  ;;  %1977 = vmatpush3.msra.mxu1 %v863_v6 }
 0x46e   : > { %1974 = vmatmul.mubr.msk.f32.vlgmr.msra.gmra.mrb[2].mxu0 %vm866_vm2, %v1208_v9  ;;  %1979 = vmatmul.mubr.msk.f32.vlgmr.msra.gmra.mrb[8].mxu1 %vm866_vm2, %v1210_v10 }
 0x46f   : > { %1981 = vmatprep.subr.mxu0 %v2279_v1  ;;  %1986 = vmatprep.subr.mxu1 %v2279_v1 }
 0x470   : > { %1982 = vmatpush3.msra.mxu0 %v864_v12  ;;  %1987 = vmatpush3.msra.mxu1 %v865_v13 }
 0x471   : > { %1983 = vmatprep.mubr.msk.f32.mxu0 %vm2278_vm0, %v2279_v1  ;;  %1988 = vmatprep.mubr.msk.f32.mxu1 %vm2278_vm0, %v2279_v1 }
 0x472   : > { %1984 = vmatmul.mubr.msk.f32.vlgmr.msra.gmra.mrb[4].mxu0 %vm866_vm2, %v1212_v18  ;;  %1989 = vmatmul.mubr.msk.f32.vlgmr.msra.gmra.mrb[10].mxu1 %vm866_vm2, %v1214_v11 }
 0x473   : > { %2008 = vmatprep.subr.bf16.mxu0 %v2277_v0  ;;  %1999 = vmatprep.mubr.msk.f32.mxu0 %vm2278_vm0, %v2279_v1 }
 0x474   : > { %2010 = vmatpush3.bf16.msra.mxu0 %v2009_v20 }
 0x475   : > { %2011 = vmatprep.subr.bf16.mxu0 %v2277_v0 }
 0x478   : > { %2013 = vmatpush3.bf16.msra.mxu0 %v2012_v44 }
 0x541   : > { %v1284_v21 = vpop.f32.mrb[2].mxu0  ;;  %v1357_v22 = vpop.f32.mrb[8].mxu1 }
 0x542   : > { %v1975_v23 = vpop.f32.mrb[3].mxu0  ;;  %v1980_v24 = vpop.f32.mrb[9].mxu1 }
 0x545   : > { %v1430_v25 = vpop.f32.mrb[4].mxu0  ;;  %v1503_v26 = vpop.f32.mrb[10].mxu1 }
 0x546   : > { %v1507_v27 = vcombine.low %v1284_v21, %v1430_v25  ;;  %v1508_v29 = vcombine.high %v1284_v21, %v1430_v25  ;;  %v1523_v30 = vcombine.low %v1357_v22, %v1503_v26  ;;  %v1524_v31 = vcombine.high %v1357_v22, %v1503_v26  ;;  %v1985_v32 = vpop.f32.mrb[5].mxu0  ;;  %v1990_v33 = vpop.f32.mrb[11].mxu1 }
 0x548   : > { %v1515_v1 = vrot.slane %v1507_v27, %v2547_v28  ;;  %v1522_v34 = vrot.slane %v1508_v29, %v2547_v28  ;;  %v1531_v36 = vrot.slane %v1523_v30, %v2547_v28  ;;  %v1538_v0 = vrot.slane %v1524_v31, %v2547_v28  ;;  %v1909_v27 = vld [vmem:[%s2752_s6] ss:$0 sm:$0xff] }
 0x54a   : > { %v1539_v37 = vcombine.low %v1515_v1, %v1531_v36  ;;  %v1540_v38 = vcombine.high %v1515_v1, %v1531_v36  ;;  %v1555_v16 = vcombine.low %v1522_v34, %v1538_v0  ;;  %v1556_v15 = vcombine.high %v1522_v34, %v1538_v0 }
 0x54c   : > { %v1547_v40 = vrot.slane %v1539_v37, %v2549_v35  ;;  %v1554_v41 = vrot.slane %v1540_v38, %v2549_v35  ;;  %v1563_v42 = vrot.slane %v1555_v16, %v2549_v35  ;;  %v1570_v43 = vrot.slane %v1556_v15, %v2549_v35 }
 0x54e   : > { %v1575_v45 = vcombine.low %v1547_v40, %v1554_v41  ;;  %v1904_v46 = vcombine.high %v1547_v40, %v1554_v41  ;;  %v1591_v47 = vcombine.low %v1563_v42, %v1570_v43  ;;  %v1905_v48 = vcombine.high %v1563_v42, %v1570_v43 }
 0x550   : > { %v1582_v49 = vrot.slane %v1575_v45, %v2547_v28  ;;  %v1590_v50 = vrot.slane %v1904_v46, %v2547_v28  ;;  %v1598_v51 = vrot.slane %v1591_v47, %v2547_v28  ;;  %v1606_v52 = vrot.slane %v1905_v48, %v2547_v28 }
 0x552   : > { %v1608_v53 = vcombine.high %v1582_v49, %v1590_v50  ;;  %v1624_v54 = vcombine.high %v1598_v51, %v1606_v52  ;;  %v1607_v55 = vcombine.low %v1582_v49, %v1590_v50  ;;  %v1623_v56 = vcombine.low %v1598_v51, %v1606_v52 }
 0x554   : > { %v1622_v57 = vrot.slane %v1608_v53, %v2549_v35  ;;  %v1638_v58 = vrot.slane %v1624_v54, %v2549_v35  ;;  %v1615_v59 = vrot.slane %v1607_v55, %v2549_v35  ;;  %v1631_v60 = vrot.slane %v1623_v56, %v2549_v35  ;;  %v1906_v35 = vld [vmem:[%s2750_s4] ss:$0 sm:$0xff] }
 0x556   : > { %v1641_v61 = vcombine.low %v1622_v57, %v1638_v58  ;;  %v1640_v62 = vcombine.high %v1615_v59, %v1631_v60  ;;  %v1642_v63 = vcombine.high %v1622_v57, %v1638_v58  ;;  %v1639_v2 = vcombine.low %v1615_v59, %v1631_v60 }
 0x558   : > { %1648 = vrot.lane.b32.xlu1 %v1641_v61, %s2287_s21  ;;  %1644 = vrot.lane.b32.xlu0 %v1640_v62, %s2288_s15 }
 0x55c   : > { %1652 = vrot.lane.b32.xlu0 %v1642_v63, %s2289_s19  ;;  %s2701_s19 = scalar_lea.hbm %s2753_s7, %s1911_s22 }
 0x5ca   : > { %v1645_v28 = vpop.permute.xlu0 %1644  ;;  %v1649_v3 = vpop.permute.xlu1 %1648 }
 0x5cb   : > { %v1655_v4 = vsel %vm866_vm2, %v1639_v2, %v1645_v28 }
 0x5cc   : > { %v1657_v6 = vsel %vm1656_vm3, %v1655_v4, %v1649_v3 }
 0x5ce   : > { %v1653_v5 = vpop.permute.xlu0 %1652 }
 0x5cf   : > { %v1659_v7 = vsel %vm1658_vm4, %v1657_v6, %v1653_v5 }
 0x5d0   : > { %2000 = vmatmul.mubr.msk.f32.vlgmr.msra.gmra.mrb[6].mxu0 %vm342_vm1, %v1659_v7 }
 0x6a3   : > { %v1735_v9 = vpop.f32.mrb[6].mxu0 }
 0x6a4   : > { %v1736_v10 = vadd.f32 %v1906_v35, %v1735_v9  ;;  %v2001_v12 = vpop.f32.mrb[7].mxu0 }
 0x6a6   : > { %v1739_v13 = vadd.f32 %v1736_v10, %v2521_v8  ;;  %v1908_v8 = vld [vmem:[%s2751_s5] ss:$0 sm:$0xff] }
 0x6a8   : > { %v1740_v18 = vsel %vm342_vm1, %v1739_v13, 0.0 }
 0x6a9   : > { %1741 = vadd.xlane.f32.xlu1 %v1740_v18 }
 0x736   : > { %v1742_v11 = vpop.xlane.xlu1 %1741 }
 0x737   : > { %v1744_v17 = vmul.f32 0.03125, %v1742_v11 }
 0x739   : > { %v1745_v19 = vsub.f32 %v1739_v13, %v1744_v17 }
 0x73b   : > { %v1746_v20 = vmul.f32 %v1745_v19, %v1745_v19 }
 0x73d   : > { %v1747_v21 = vsel %vm342_vm1, %v1746_v20, 0.0 }
 0x73e   : > { %1748 = vadd.xlane.f32.xlu0 %v1747_v21 }
 0x7cb   : > { %v1749_v22 = vpop.xlane.xlu0 %1748 }
 0x7cc   : > { %v1750_v23 = vmul.f32 0.03125, %v1749_v22 }
 0x7ce   : > { %v1751_v24 = vadd.f32 1e-05, %v1750_v23 }
 0x7d0   : > { %2112 = vrsqrt.f32 %v1751_v24 }
 0x7da   : > { %v2113_v25 = vpop.eup %2112 }
 0x7db   : > { %v1753_v26 = vmul.f32 %v2113_v25, %v1745_v19 }
 0x7dd   : > { %v1760_v29 = vmul.f32 %v1908_v8, %v1753_v26 }
 0x7df   : > { %v1767_v30 = vadd.f32 %v1909_v27, %v1760_v29 }
 0x7e1   : > { %1768 = vst.msk [vmem:[%s322_s10] sm:$0xff] %vm342_vm1, %v1767_v30 }
 0x7e2   : > { %2213 = shalt.err (!%p2210_p2)
}
 0x7e3   : > { %s2214_s12 = scalar_lea.hbm %s2701_s19, 128  ;;  %s2218_s11 = scalar_lea.hbm %s2753_s7, 256 }
 0x7e4   : > { %p2215_p13 = scmp.ne.s32.totalorder %s2701_s19, %s2214_s12  ;;  %p2219_p4 = scmp.lt.u32.totalorder %s2701_s19, %s2753_s7 }
 0x7e5   : > { %p2220_p5 = scmp.lt.u32.totalorder %s2218_s11, %s2214_s12  ;;  %p2222_p11 = scmp.lt.u32.totalorder %s2214_s12, %s2701_s19 }
 0x7e6   : > { %p2216_p6 = pnand %p2215_p13, %p2767_p0 }
 0x7e7   : > { %p2221_p8 = por %p2220_p5, %p2219_p4 }
 0x7e8   : > { %p2217_p10 = pneg %p2216_p6 }
 0x7e9   : > { %p2223_p1 = por %p2222_p11, %p2221_p8 }
 0x7eb   : > { %p2224_p3 = pnand %p2223_p1, %p2217_p10 }
 0x7ed   : > { %2227 = shalt.err (!%p2224_p3)
}
 0x7ee   : > { %2024 = dma.vmem_to_hbm [thread:$0]  (%p2767_p0), %s2703_s18, 128, %s2701_s19, %s1770_s23  }
 0x7ef PF: > { %s1795_s21 = sand.u32 1, %s2258_s24   ;;  %p2768_p7 = scmp.ne.s32.totalorder %s2758_s8, 0 }
 0x7f0   : > { %p2769_p9 = scmp.ge.s32.totalorder %s2270_s27, 2  ;;  %s1796_s15 = scalar_lea.sflag [#allocation4], %s1795_s21 }
 0x7f2   : > { %p2038_p12 = pnand %p2769_p9, %p2768_p7 }
 0x7f4   : > { %2253 = dma.done.wait (!%p2038_p12), %s1796_s15, 128  }
 0x7f5   : > { %2255 = vsyncadd (!%p2038_p12), %s1796_s15, 4294967168  ;;  %p21_p2 = scmp.ge.s32.totalorder %s2441_s13, 4   ;;  %s2770_s24 = smov %s2262_s25 }
 0x7f6   : > { %s2771_s25 = smov %s2266_s26  ;;  %s2772_s26 = smov %s2457_s17 }
 0x7f7   : > { %s2773_s27 = smov %s2441_s13  ;;  %23 = sbr.rel (!%p21_p2) target bundleno = 6 (0x6), region = 101 }
 0x7fe   :  { %1801 = vsyncpa [#allocation3], 1 }
 0x7ff   :  { %1803 = vsyncpa [#allocation3 + $0x1], 1 }
 0x800   :  { %1804 = vsyncpa [#allocation6], 1 }
 0x801   :  { %1805 = vsyncpa [#allocation4], 1 }
 0x802   :  { %1807 = vsyncpa [#allocation4 + $0x1], 1 }

</bundles_post_ra>
